<compile_context>
chip_gen: v6e
topology: v6e:2x2x1
jax: 0.10.0
libtpu: 0.0.40
codegen_flags: <defaults>
</compile_context>

<pallas_src>
from functools import partial

import jax
import jax.numpy as jnp
from jax.experimental import pallas as pl
from jax.experimental.pallas import tpu as pltpu


def _round_up(a: int, b: int) -> int:
    return ((a + b - 1) // b) * b


def _chip_defaults():
    """Return (num_cores, tm_target) for the current TPU generation.

    num_cores: size of the leading CORE_PARALLEL grid axis (2 TCs on v7x only).
    tm_target: row-tile size; one input block is tm x 128 f32 = tm/256 MiB.
    """
    kind = ""
    try:
        kind = (jax.devices()[0].device_kind or "").lower()
    except Exception:
        pass
    if "v7" in kind or "tpu7" in kind:
        return 2, 8192   # 2 in x 2 buf x 4 MiB = 16 MiB < 32 MiB scoped default
    if "v6" in kind:
        return 1, 4096   # 2 in x 2 buf x 2 MiB = 8 MiB
    return 1, 2048       # v5e & unknown: 2 in x 2 buf x 1 MiB = 4 MiB < 16 MiB


def _sum_of_criterions_kernel(x_ref, y_ref, o_ref, sse_acc, sae_acc, *,
                              weights, n_valid):
    """Fused weighted-MSE + L1 partial-sum kernel.

    Grid = (num_cores, steps): axis 0 shards across TensorCores (v7x), axis 1
    is the reduction over row-tiles.  Scratch accumulators persist across
    axis-1 steps; the weighted combination is written once per core.
    """
    c = pl.program_id(0)
    i = pl.program_id(1)
    steps = pl.num_programs(1)

    tm, lanes = x_ref.shape              # static block shape
    chunk_rows = min(128, tm)            # sub-chunk: bounds vreg live ranges
    n_chunks = tm // chunk_rows          # tm is a multiple of chunk_rows

    @pl.when(i == 0)
    def _init():
        sse_acc[...] = jnp.zeros_like(sse_acc)
        sae_acc[...] = jnp.zeros_like(sae_acc)

    # First flat element index this block is *assumed* to cover (the index
    # map clamps fully-out-of-range blocks; the mask below zeroes their data).
    block_elem0 = (c * steps + i) * (tm * lanes)

    # Hoisted (chunk_rows, lanes) local element-index grid, reused by every
    # sub-chunk (don't rebuild the iota inside the loop).
    local_idx = (jax.lax.broadcasted_iota(jnp.int32, (chunk_rows, lanes), 0) * lanes
                 + jax.lax.broadcasted_iota(jnp.int32, (chunk_rows, lanes), 1))

    def body(j, carry):
        sse, sae = carry
        r0 = j * chunk_rows
        if not isinstance(r0, int):
            r0 = pl.multiple_of(r0, chunk_rows)
        xv = x_ref[pl.ds(r0, chunk_rows), :].astype(jnp.float32)
        yv = y_ref[pl.ds(r0, chunk_rows), :].astype(jnp.float32)
        # Zero every element whose flat index is >= n_valid (ragged tail /
        # unspecified padding) BEFORE squaring / abs.
        limit = n_valid - (block_elem0 + r0 * lanes)
        d = jnp.where(local_idx < limit, xv - yv, 0.0)
        # Fold only along the row axis: (chunk,128)->(chunk/8,8,128) matches
        # the native (8,128) tiling, so the axis-0 sum is pure VPU work.
        d3 = d.reshape(-1, 8, lanes)
        sse = sse + jnp.sum(d3 * d3, axis=0)
        sae = sae + jnp.sum(jnp.abs(d3), axis=0)
        return sse, sae

    init = (sse_acc[...], sae_acc[...])
    if n_chunks == 1:
        sse, sae = body(0, init)
    else:
        sse, sae = jax.lax.fori_loop(0, n_chunks, body, init)
    sse_acc[...] = sse
    sae_acc[...] = sae

    @pl.when(i == steps - 1)
    def _finalize():
        # Apply criterion weights once per core; lane-dense (1,8,128) write.
        o_ref[...] = (weights[0] * sse_acc[...] + weights[1] * sae_acc[...])[None]


def sum_of_criterions(x, y, weights=(0.7, 0.3)):
    """loss = weights[0]*MSE(x,y) + weights[1]*L1(x,y), both 'mean' reduced."""
    assert x.shape == y.shape
    n = int(x.size)
    lanes = 128

    num_cores, tm_target = _chip_defaults()

    # Flatten (free reshape).  Pad only in the rare lane-unaligned case, and
    # only up to the next multiple of 128 (needed for the 2-D view).
    xf = x.reshape(-1)
    yf = y.reshape(-1)
    rows = pl.cdiv(n, lanes)
    if n % lanes:
        pad = rows * lanes - n
        xf = jnp.pad(xf, (0, pad))
        yf = jnp.pad(yf, (0, pad))
    xf = xf.reshape(rows, lanes)
    yf = yf.reshape(rows, lanes)

    # Row tile: as large as the per-generation target allows, multiple of the
    # in-kernel sub-chunk size so the fori_loop tiles the block evenly.
    tm = min(tm_target, _round_up(pl.cdiv(rows, num_cores), 8))
    chunk_rows = min(128, tm)
    tm = _round_up(tm, chunk_rows)
    steps = pl.cdiv(rows, num_cores * tm)
    max_block = pl.cdiv(rows, tm) - 1    # last block index that starts in-bounds

    def in_map(c, i):
        # Clamp a fully-out-of-range block to the last valid block (no OOB
        # DMA); its contribution is zeroed by the in-kernel mask.
        return (jnp.minimum(c * steps + i, max_block), 0)

    if num_cores > 1:
        dim_sem = (pltpu.CORE_PARALLEL, pltpu.ARBITRARY)   # real 2-TC split (v7x)
    else:
        dim_sem = (pltpu.ARBITRARY, pltpu.ARBITRARY)

    kernel = partial(_sum_of_criterions_kernel,
                     weights=tuple(float(w) for w in weights),
                     n_valid=n)

    itemsize = jnp.dtype(x.dtype).itemsize
    out = pl.pallas_call(
        kernel,
        out_shape=jax.ShapeDtypeStruct((num_cores, 8, lanes), jnp.float32),
        grid_spec=pltpu.PrefetchScalarGridSpec(
            num_scalar_prefetch=0,
            grid=(num_cores, steps),
            in_specs=[
                pl.BlockSpec((tm, lanes), in_map),
                pl.BlockSpec((tm, lanes), in_map),
            ],
            out_specs=pl.BlockSpec((1, 8, lanes), lambda c, i: (c, 0, 0)),
            scratch_shapes=[
                pltpu.VMEM((8, lanes), jnp.float32),   # SSE accumulator
                pltpu.VMEM((8, lanes), jnp.float32),   # SAE accumulator
            ],
        ),
        compiler_params=pltpu.CompilerParams(dimension_semantics=dim_sem),
        cost_estimate=pl.CostEstimate(
            flops=5 * n,
            transcendentals=0,
            bytes_accessed=2 * itemsize * n + 4 * num_cores * 8 * lanes,
        ),
    )(xf, yf)

    # One cheap cross-lane reduce + 'mean' normalization outside the kernel
    # (divide by the TRUE element count).
    return jnp.sum(out) / jnp.float32(n)


def _reference(x, y, weights=(0.7, 0.3)):
    d = x.astype(jnp.float32) - y.astype(jnp.float32)
    return weights[0] * jnp.mean(d * d) + weights[1] * jnp.mean(jnp.abs(d))


if __name__ == "__main__":
    key = jax.random.PRNGKey(0)
    kx, ky = jax.random.split(key)
    # NCHW inputs, matching the PyTorch convention.
    x = jax.random.normal(kx, (2, 4, 16, 16), dtype=jnp.float32)
    y = jax.random.normal(ky, (2, 4, 16, 16), dtype=jnp.float32)

    loss = jax.block_until_ready(sum_of_criterions(x, y))
    ref = _reference(x, y)
    assert jnp.allclose(loss, ref, rtol=1e-5, atol=1e-5), (loss, ref)

    # Extra small shapes exercising the ragged-tail mask and the multi-chunk
    # in-kernel loop.
    for extra_shape in ((3, 5, 17, 19), (4, 8, 32, 32)):
        ka, kb = jax.random.split(jax.random.PRNGKey(1))
        xs = jax.random.normal(ka, extra_shape, dtype=jnp.float32)
        ys = jax.random.normal(kb, extra_shape, dtype=jnp.float32)
        got = jax.block_until_ready(sum_of_criterions(xs, ys))
        want = _reference(xs, ys)
        assert jnp.allclose(got, want, rtol=1e-5, atol=1e-5), (extra_shape, got, want)

    print("KERNEL_OK")
</pallas_src>

<mosaic_0001>
module attributes {stable_mosaic.version = 11 : i64} {
  func.func @_sum_of_criterions_kernel(%arg0: i32, %arg1: i32, %arg2: memref<16x128xf32, #tpu.memory_space<vmem>>, %arg3: memref<16x128xf32, #tpu.memory_space<vmem>>, %arg4: memref<1x8x128xf32, #tpu.memory_space<vmem>>, %arg5: memref<8x128xf32, #tpu.memory_space<vmem>>, %arg6: memref<8x128xf32, #tpu.memory_space<vmem>>) attributes {dimension_semantics = [#tpu.dimension_semantics<arbitrary>, #tpu.dimension_semantics<arbitrary>], iteration_bounds = array<i64: 1, 1>, scalar_prefetch = 0 : i64, scratch_operands = 2 : i64, tpu.core_type = #tpu.core_type<tc>, window_params = [{transform_indices = @transform_0, window_bounds = array<i64: 16, 128>}, {transform_indices = @transform_1, window_bounds = array<i64: 16, 128>}, {transform_indices = @transform_2, window_bounds = array<i64: 1, 8, 128>}]} {
    %c0_i32 = arith.constant 0 : i32
    %0 = arith.cmpi eq, %arg1, %c0_i32 : i32
    %1 = arith.extui %0 : i1 to i32
    %c0_i32_0 = arith.constant 0 : i32
    %2 = arith.cmpi ne, %1, %c0_i32_0 : i32
    scf.if %2 {
      %cst_18 = arith.constant 0.000000e+00 : f32
      %34 = vector.broadcast %cst_18 : f32 to vector<8x128xf32>
      %c0_19 = arith.constant 0 : index
      %c0_20 = arith.constant 0 : index
      %35 = vector.load %arg5[%c0_19, %c0_20] : memref<8x128xf32, #tpu.memory_space<vmem>>, vector<8x128xf32>
      tpu.vector_store %arg5[%c0_19, %c0_20], %34 {strides = array<i32>} : memref<8x128xf32, #tpu.memory_space<vmem>>, vector<8x128xf32>,
      %cst_21 = arith.constant 0.000000e+00 : f32
      %36 = vector.broadcast %cst_21 : f32 to vector<8x128xf32>
      %c0_22 = arith.constant 0 : index
      %c0_23 = arith.constant 0 : index
      %37 = vector.load %arg6[%c0_22, %c0_23] : memref<8x128xf32, #tpu.memory_space<vmem>>, vector<8x128xf32>
      tpu.vector_store %arg6[%c0_22, %c0_23], %36 {strides = array<i32>} : memref<8x128xf32, #tpu.memory_space<vmem>>, vector<8x128xf32>,
    } else {
    }
    %c1_i32 = arith.constant 1 : i32
    %3 = arith.muli %arg0, %c1_i32 : i32
    %4 = arith.addi %3, %arg1 : i32
    %c2048_i32 = arith.constant 2048 : i32
    %5 = arith.muli %4, %c2048_i32 : i32
    %6 = tpu.iota {dimensions = array<i32: 0>} : vector<16x128xi32>
    %c128_i32 = arith.constant 128 : i32
    %7 = vector.broadcast %c128_i32 : i32 to vector<16x128xi32>
    %8 = arith.muli %6, %7 : vector<16x128xi32>
    %9 = tpu.iota {dimensions = array<i32: 1>} : vector<16x128xi32>
    %10 = arith.addi %8, %9 : vector<16x128xi32>
    %c0 = arith.constant 0 : index
    %c0_1 = arith.constant 0 : index
    %11 = vector.load %arg5[%c0, %c0_1] : memref<8x128xf32, #tpu.memory_space<vmem>>, vector<8x128xf32>
    %c0_2 = arith.constant 0 : index
    %c0_3 = arith.constant 0 : index
    %12 = vector.load %arg6[%c0_2, %c0_3] : memref<8x128xf32, #tpu.memory_space<vmem>>, vector<8x128xf32>
    %c0_4 = arith.constant 0 : index
    %c0_5 = arith.constant 0 : index
    %13 = vector.load %arg2[%c0_4, %c0_5] : memref<16x128xf32, #tpu.memory_space<vmem>>, vector<16x128xf32>
    %c0_6 = arith.constant 0 : index
    %c0_7 = arith.constant 0 : index
    %14 = vector.load %arg3[%c0_6, %c0_7] : memref<16x128xf32, #tpu.memory_space<vmem>>, vector<16x128xf32>
    %c0_i32_8 = arith.constant 0 : i32
    %15 = arith.addi %5, %c0_i32_8 : i32
    %c2048_i32_9 = arith.constant 2048 : i32
    %16 = arith.subi %c2048_i32_9, %15 : i32
    %17 = vector.broadcast %16 : i32 to vector<16x128xi32>
    %18 = arith.cmpi slt, %10, %17 : vector<16x128xi32>
    %19 = arith.subf %13, %14 : vector<16x128xf32>
    %cst = arith.constant 0.000000e+00 : f32
    %20 = vector.broadcast %cst : f32 to vector<16x128xf32>
    %21 = arith.select %18, %19, %20 : vector<16x128xi1>, vector<16x128xf32>
    %22 = vector.shape_cast %21 : vector<16x128xf32> to vector<2x8x128xf32>
    %23 = arith.mulf %22, %22 : vector<2x8x128xf32>
    %cst_10 = arith.constant dense<0.000000e+00> : vector<8x128xf32>
    %24 = vector.multi_reduction <add>, %23, %cst_10 [0] : vector<2x8x128xf32> to vector<8x128xf32>
    %25 = arith.addf %11, %24 : vector<8x128xf32>
    %26 = math.absf %22 : vector<2x8x128xf32>
    %cst_11 = arith.constant dense<0.000000e+00> : vector<8x128xf32>
    %27 = vector.multi_reduction <add>, %26, %cst_11 [0] : vector<2x8x128xf32> to vector<8x128xf32>
    %28 = arith.addf %12, %27 : vector<8x128xf32>
    %c0_12 = arith.constant 0 : index
    %c0_13 = arith.constant 0 : index
    %29 = vector.load %arg5[%c0_12, %c0_13] : memref<8x128xf32, #tpu.memory_space<vmem>>, vector<8x128xf32>
    tpu.vector_store %arg5[%c0_12, %c0_13], %25 {strides = array<i32>} : memref<8x128xf32, #tpu.memory_space<vmem>>, vector<8x128xf32>,
    %c0_14 = arith.constant 0 : index
    %c0_15 = arith.constant 0 : index
    %30 = vector.load %arg6[%c0_14, %c0_15] : memref<8x128xf32, #tpu.memory_space<vmem>>, vector<8x128xf32>
    tpu.vector_store %arg6[%c0_14, %c0_15], %28 {strides = array<i32>} : memref<8x128xf32, #tpu.memory_space<vmem>>, vector<8x128xf32>,
    %c0_i32_16 = arith.constant 0 : i32
    %31 = arith.cmpi eq, %arg1, %c0_i32_16 : i32
    %32 = arith.extui %31 : i1 to i32
    %c0_i32_17 = arith.constant 0 : i32
    %33 = arith.cmpi ne, %32, %c0_i32_17 : i32
    scf.if %33 {
      %c0_18 = arith.constant 0 : index
      %c0_19 = arith.constant 0 : index
      %34 = vector.load %arg5[%c0_18, %c0_19] : memref<8x128xf32, #tpu.memory_space<vmem>>, vector<8x128xf32>
      %cst_20 = arith.constant 0.699999988 : f32
      %35 = vector.broadcast %cst_20 : f32 to vector<8x128xf32>
      %36 = arith.mulf %35, %34 : vector<8x128xf32>
      %c0_21 = arith.constant 0 : index
      %c0_22 = arith.constant 0 : index
      %37 = vector.load %arg6[%c0_21, %c0_22] : memref<8x128xf32, #tpu.memory_space<vmem>>, vector<8x128xf32>
      %cst_23 = arith.constant 3.000000e-01 : f32
      %38 = vector.broadcast %cst_23 : f32 to vector<8x128xf32>
      %39 = arith.mulf %38, %37 : vector<8x128xf32>
      %40 = arith.addf %36, %39 : vector<8x128xf32>
      %41 = vector.shape_cast %40 : vector<8x128xf32> to vector<1x8x128xf32>
      %c0_24 = arith.constant 0 : index
      %c0_25 = arith.constant 0 : index
      %c0_26 = arith.constant 0 : index
      %42 = vector.load %arg4[%c0_24, %c0_25, %c0_26] : memref<1x8x128xf32, #tpu.memory_space<vmem>>, vector<1x8x128xf32>
      tpu.vector_store %arg4[%c0_24, %c0_25, %c0_26], %41 {strides = array<i32>} : memref<1x8x128xf32, #tpu.memory_space<vmem>>, vector<1x8x128xf32>,
    } else {
    }
    return
  }
  func.func @transform_0(%arg0: i32, %arg1: i32) -> (i32, i32) {
    %c1_i32 = arith.constant 1 : i32
    %0 = arith.muli %arg0, %c1_i32 : i32
    %1 = arith.addi %0, %arg1 : i32
    %c0_i32 = arith.constant 0 : i32
    %2 = arith.minsi %1, %c0_i32 : i32
    %c0_i32_0 = arith.constant 0 : i32
    %c0_i32_1 = arith.constant 0 : i32
    return %2, %c0_i32_0 : i32, i32
  }
  func.func @transform_1(%arg0: i32, %arg1: i32) -> (i32, i32) {
    %c1_i32 = arith.constant 1 : i32
    %0 = arith.muli %arg0, %c1_i32 : i32
    %1 = arith.addi %0, %arg1 : i32
    %c0_i32 = arith.constant 0 : i32
    %2 = arith.minsi %1, %c0_i32 : i32
    %c0_i32_0 = arith.constant 0 : i32
    %c0_i32_1 = arith.constant 0 : i32
    return %2, %c0_i32_0 : i32, i32
  }
  func.func @transform_2(%arg0: i32, %arg1: i32) -> (i32, i32, i32) {
    %c0_i32 = arith.constant 0 : i32
    %c0_i32_0 = arith.constant 0 : i32
    %c0_i32_1 = arith.constant 0 : i32
    return %arg0, %c0_i32, %c0_i32_0 : i32, i32, i32
  }
}

</mosaic_0001>

<bundles_post_ra>
// kernel: tpu_custom_call.1
= control target key start
LH: loop header
LB: loop body
LE: loop exit
PB: predicated region body
PF: predicated region fallthrough
CT: control target
= control target key end

     0   :  { %7 = vsyncpa [#allocation5], 0  ;;  %s230_s0 = inlined_call_operand.hbm [shape: f32[16,128], index: 0, kind: input, shape index: {}]   ;;  %s231_s1 = inlined_call_operand.hbm [shape: f32[16,128], index: 1, kind: input, shape index: {}]   ;;  %s232_s2 = inlined_call_operand.hbm [shape: f32[1,8,128], index: 2, kind: output, shape index: {}]  }
   0x1   :  { %8 = vsyncpa [#allocation8], 0 }
   0x2   :  { %9 = vsyncpa [#allocation6], 0  ;;  %s201_s9 = smov [#allocation4]  }
   0x3   :  { %s21_s10 = sshll.u32 %s201_s9, 4  ;;  %s22_s10 = int_to_ptr.vmem [resolvable:$true] %s21_s10 }
   0x4   :  { %s143_s11 = scalar_lea.vmem %s22_s10, 256  ;;  %p148_p1 = scmp.lt.s32.totalorder %s22_s10, %s22_s10 }
   0x5   :  { %p144_p0 = scmp.ne.s32.totalorder %s22_s10, %s143_s11  ;;  %p149_p2 = scmp.lt.s32.totalorder %s143_s11, %s143_s11 }
   0x7   :  { %p150_p3 = por %p149_p2, %p148_p1 }
   0x9   :  { %p151_p4 = pnand %p150_p3, %p144_p0 }
   0xb   :  { %154 = shalt.err (!%p151_p4)
}
   0xc   :  { %s202_s12 = smov 128   ;;  %s203_s13 = smov 8  }
   0xd   :  { %27 = dma.hbm_to_vmem [thread:$0]  %s230_s0, 256, %s22_s10, [#allocation5], %s202_s12, %s202_s12, %s203_s13  }
   0xe   :  { %s204_s16 = smov [#allocation7]  }
   0xf   :  { %s39_s17 = sshll.u32 %s204_s16, 4  ;;  %s40_s17 = int_to_ptr.vmem [resolvable:$true] %s39_s17 }
  0x10   :  { %s163_s18 = scalar_lea.vmem %s40_s17, 256  ;;  %p168_p6 = scmp.lt.s32.totalorder %s40_s17, %s40_s17 }
  0x11   :  { %p164_p5 = scmp.ne.s32.totalorder %s40_s17, %s163_s18  ;;  %p169_p7 = scmp.lt.s32.totalorder %s163_s18, %s163_s18 }
  0x13   :  { %p170_p8 = por %p169_p7, %p168_p6 }
  0x15   :  { %p171_p9 = pnand %p170_p8, %p164_p5 }
  0x17   :  { %174 = shalt.err (!%p171_p9)
}
  0x18   :  { %45 = dma.hbm_to_vmem [thread:$0]  %s231_s1, 256, %s40_s17, [#allocation8], %s202_s12, %s202_s12, %s203_s13  }
  0x19   :  { %195 = dma.done.wait [#allocation5], 256  }
  0x1a   :  { %196 = vsyncadd [#allocation5], 4294967040 }
  0x1b   :  { %197 = dma.done.wait [#allocation8], 256  }
  0x1c   :  { %198 = vsyncadd [#allocation8], 4294967040  ;;  %v68_v0 = vlaneseq  ;;  %v79_v7 = vld [vmem:[#allocation4] sm:$0xff]  ;;  %v80_v8 = vld [vmem:[#allocation4 + $0x8] sm:$0xff]  ;;  %s205_s0 = smov [#allocation9]  }
  0x1d   :  { %v81_v9 = vld [vmem:[#allocation7] sm:$0xff]  ;;  %v82_v11 = vld [vmem:[#allocation7 + $0x8] sm:$0xff]  ;;  %s116_s1 = sshll.u32 %s205_s0, 4  ;;  %s117_s1 = int_to_ptr.vmem [resolvable:$true] %s116_s1 }
  0x1e   :  { %v69_v1 = vshrl.u32 %v68_v0, 7  ;;  %v74_v2 = vand.u32 127, %v68_v0  ;;  %v87_v12 = vsub.f32 %v79_v7, %v81_v9  ;;  %v88_v13 = vsub.f32 %v80_v8, %v82_v11  ;;  %s175_s21 = scalar_lea.vmem %s117_s1, 128  ;;  %p180_p11 = scmp.lt.s32.totalorder %s117_s1, %s117_s1 }
  0x1f   :  { %p176_p10 = scmp.ne.s32.totalorder %s117_s1, %s175_s21  ;;  %p181_p12 = scmp.lt.s32.totalorder %s175_s21, %s175_s21 }
  0x20   :  { %v70_v3 = vadd.s32 8, %v69_v1  ;;  %v71_v4 = vmul.u32 128, %v69_v1 }
  0x21   :  { %p182_p13 = por %p181_p12, %p180_p11 }
  0x22   :  { %v72_v5 = vmul.u32 128, %v70_v3  ;;  %v75_v6 = vadd.s32 %v74_v2, %v71_v4 }
  0x23   :  { %p183_p0 = pnand %p182_p13, %p176_p10 }
  0x24   :  { %v76_v10 = vadd.s32 %v74_v2, %v72_v5  ;;  %vm85_vm0 = vcmp.lt.s32.totalorder %v75_v6, 2048 }
  0x25   :  { %v89_v14 = vsel %vm85_vm0, %v87_v12, 0.0 }
  0x26   :  { %vm86_vm1 = vcmp.lt.s32.totalorder %v76_v10, 2048  ;;  %v91_v16 = vmul.f32 %v89_v14, %v89_v14  ;;  %v95_v17 = vand.u32 2147483647, %v89_v14 }
  0x27   :  { %v90_v15 = vsel %vm86_vm1, %v88_v13, 0.0 }
  0x28   :  { %v92_v18 = vmul.f32 %v90_v15, %v90_v15  ;;  %v96_v19 = vand.u32 2147483647, %v90_v15 }
  0x2a   :  { %v93_v20 = vadd.f32 %v92_v18, %v91_v16  ;;  %v97_v21 = vadd.f32 %v96_v19, %v95_v17 }
  0x2c   :  { %v105_v22 = vmul.f32 0.7, %v93_v20  ;;  %v107_v23 = vmul.f32 0.3, %v97_v21 }
  0x2e   :  { %v108_v24 = vadd.f32 %v107_v23, %v105_v22 }
  0x30   :  { %109 = vst [vmem:[#allocation9] sm:$0xff] %v108_v24 }
  0x31   :  { %186 = shalt.err (!%p183_p0)
}
  0x32   :  { %119 = dma.vmem_to_hbm [thread:$0]  %s117_s1, 128, %s232_s2, [#allocation6]  }
  0x33   :  { %199 = dma.done.wait [#allocation6], 128  }
  0x34   :  { %200 = vsyncadd [#allocation6], 4294967168 }
  0x35   :  { %123 = vsyncpa [#allocation5], 1 }
  0x36   :  { %124 = vsyncpa [#allocation8], 1 }
  0x37   :  { %125 = vsyncpa [#allocation6], 1 }

</bundles_post_ra>
